<compile_context>
chip_gen: v6e
topology: v6e:2x2x1
jax: 0.10.0
libtpu: 0.0.40
codegen_flags: <defaults>
</compile_context>

<pallas_src>
import functools
import numpy as np
import jax
import jax.numpy as jnp
from jax.experimental import pallas as pl
from jax.experimental.pallas import tpu as pltpu


def _round_up(x, m):
    return (x + m - 1) // m * m


def _decoder_kernel(emb_ref, slab_ref, out_ref, *, E, H, T):
    B = emb_ref.shape[0]
    G = 4 * H                      # gate width (i|f|g|o)
    Wp = slab_ref.shape[1]         # fused weight width (multiple of 128)
    r = E + H                      # row offset of the small-vector block

    # Static slices of the packed weight slab (no extra DMAs).
    wpro = slab_ref[0:E, 0:G]              # (E, G)  W_embed @ W_hh
    wcomb = slab_ref[E:E + H, :]           # (H, Wp) [W_hh | W_out | W_stop | 0]
    wih0 = slab_ref[r + 0:r + 1, 0:G]      # (1, G)  W_ih row 0
    wih1 = slab_ref[r + 1:r + 2, 0:G]      # (1, G)  W_ih row 1
    bcomb = slab_ref[r + 2:r + 3, :]       # (1, Wp) [b_ih+b_hh | b_out | b_stop | 0]
    bpro = slab_ref[r + 3:r + 4, 0:G]      # (1, G)  b_embed @ W_hh + b_ih + b_hh

    # Hoisted loop-invariant constants / broadcasts.
    lane_g = jax.lax.broadcasted_iota(jnp.int32, (B, G), 1)
    g_mask = jnp.logical_and(lane_g >= 2 * H, lane_g < 3 * H)   # tanh lanes (g)
    g_scale = jnp.where(g_mask, jnp.float32(2.0), jnp.float32(1.0))
    wih0_b = jnp.broadcast_to(wih0, (B, G))
    wih1_b = jnp.broadcast_to(wih1, (B, G))
    bcomb_b = jnp.broadcast_to(bcomb, (B, Wp))
    bpro_b = jnp.broadcast_to(bpro, (B, G))

    # Prologue (N=128, gate lanes only): hh = h_0 @ W_hh + b, with
    # h_0 = fc_embed(embedding) folded into wpro/bpro in the wrapper.
    hh = jnp.dot(emb_ref[...], wpro, preferred_element_type=jnp.float32) + bpro_b

    c = jnp.zeros((B, H), jnp.float32)
    x = None                               # decoder_input_0 == 0 (step 0 peeled)

    rows = []
    # Static unroll: T is small (8). See TODO above for large T.
    for t in range(T):
        if t == 0:
            gates = hh
        else:
            # Input contribution on the VPU (replaces a K=2 MXU matmul).
            gates = hh + x[:, 0:1] * wih0_b + x[:, 1:2] * wih1_b

        # One transcendental family per step: sigmoid(z) on i/f/o lanes,
        # tanh(z) = 2*sigmoid(2z) - 1 on the g lanes (masked pre-scale + FMA).
        s = jax.nn.sigmoid(gates * g_scale)
        act = jnp.where(g_mask, s + s - 1.0, s)
        i_g = act[:, 0 * H:1 * H]
        f_g = act[:, 1 * H:2 * H]
        g_g = act[:, 2 * H:3 * H]
        o_g = act[:, 3 * H:4 * H]
        c = f_g * c + i_g * g_g
        h = o_g * jnp.tanh(c)

        # Single fused matmul: gates for step t+1 AND heads for step t.
        # (On v5e this is two 128-lane MXU passes; W_hh sits in the first
        #  tile so the recurrence-critical lanes are produced first.)
        fused = jnp.dot(h, wcomb, preferred_element_type=jnp.float32) + bcomb_b
        hh = fused[:, 0:G]
        head4 = fused[:, G:G + 4]          # (coord_x, coord_y, stop_logit, 0)
        rows.append(head4)
        x = head4[:, 0:2]                  # feedback input = raw coord

    # Single lane-dense store; step t occupies lanes [4t, 4t+4).
    slab_out = jnp.concatenate(rows, axis=1)                     # (B, 4T)
    lane_o = jax.lax.broadcasted_iota(jnp.int32, (B, 4 * T), 1)
    stop_mask = (lane_o % 4) == 2
    # Deferred stop sigmoid: one full-width EUP push at the epilogue.
    out_ref[...] = jnp.where(stop_mask, jax.nn.sigmoid(slab_out), slab_out)


@functools.partial(jax.jit, static_argnames=("max_seq_length",))
def coordinate_decoder_full(embedding, params, max_seq_length):
    """Full-length decode (no truncation). Returns (coords, stops, t_eff)."""
    B, E = embedding.shape
    H = params["whh"].shape[0]
    G = 4 * H
    T = int(max_seq_length)
    Wp = _round_up(G + 4, 128)             # fused weight width (256 for H=32)
    hi = jax.lax.Precision.HIGHEST

    # Fused recurrent + head weights / biases (built under jit, tiny).
    wcomb = jnp.zeros((H, Wp), jnp.float32)
    wcomb = wcomb.at[:, 0:G].set(params["whh"])
    wcomb = wcomb.at[:, G:G + 2].set(params["wout"])
    wcomb = wcomb.at[:, G + 2:G + 3].set(params["wstop"])

    bcomb = jnp.zeros((1, Wp), jnp.float32)
    bcomb = bcomb.at[:, 0:G].set(params["b"])
    bcomb = bcomb.at[:, G:G + 2].set(params["bout"])
    bcomb = bcomb.at[:, G + 2:G + 3].set(params["bstop"])

    # Fused prologue: h_0 only feeds the first recurrence through W_hh, so
    # fold fc_embed into it (exact in exact arithmetic).
    wpro = jnp.dot(params["we"], params["whh"], precision=hi)            # (E, G)
    bpro = jnp.dot(params["be"], params["whh"], precision=hi) + params["b"]

    # Pack everything into one (E+H+8, Wp) slab -> single DMA.
    rows = E + H + 8
    r = E + H
    slab = jnp.zeros((rows, Wp), jnp.float32)
    slab = slab.at[0:E, 0:G].set(wpro)
    slab = slab.at[E:E + H, :].set(wcomb)
    slab = slab.at[r:r + 2, 0:G].set(params["wih"])
    slab = slab.at[r + 2:r + 3, :].set(bcomb)
    slab = slab.at[r + 3:r + 4, 0:G].set(bpro)

    kernel = functools.partial(_decoder_kernel, E=E, H=H, T=T)
    out = pl.pallas_call(
        kernel,
        out_shape=jax.ShapeDtypeStruct((B, 4 * T), jnp.float32),
        in_specs=[pl.BlockSpec(memory_space=pltpu.MemorySpace.VMEM),
                  pl.BlockSpec(memory_space=pltpu.MemorySpace.VMEM)],
        out_specs=pl.BlockSpec(memory_space=pltpu.MemorySpace.VMEM),
    )(embedding, slab)

    out3 = out.reshape(B, T, 4)
    coords = out3[..., 0:2]
    stops = out3[..., 2:3]

    # Early-stop length computed on device (no host sync):
    #   t_eff = 1 + first step where all(stop_prob > 0.5), else T.
    all_stop = jnp.all(stops > 0.5, axis=(0, 2))                 # (T,)
    first_hit = jnp.argmax(all_stop.astype(jnp.int32))
    t_eff = jnp.where(jnp.any(all_stop), first_hit + 1, T).astype(jnp.int32)
    return coords, stops, t_eff


def coordinate_decoder_pallas(embedding, params, max_seq_length):
    """PyTorch-exact output: truncates at the early-stop step.

    Only a single scalar (t_eff) is pulled to the host for the dynamic-shape
    truncation; the decode itself runs fully on device under jit.
    """
    coords, stops, t_eff = coordinate_decoder_full(
        embedding, params, max_seq_length=max_seq_length)
    t = int(t_eff)
    # TODO(synk): the len(outputs)==0 branch of the PyTorch module is
    # unreachable for max_seq_length >= 1 and is not replicated here.
    return coords[:, :t, :], stops[:, :t, :]


def init_params(key, embedding_size, hidden_size, num_layers=1):
    assert num_layers == 1
    E, H = embedding_size, hidden_size
    ks = jax.random.split(key, 10)
    u = lambda k, shape, s=0.1: jax.random.uniform(
        k, shape, dtype=jnp.float32, minval=-s, maxval=s)
    # PyTorch layouts: Linear weight (out, in), LSTM weight_ih (4H, in),
    # weight_hh (4H, H). Pre-transpose to (in, out) for the kernel.
    w_embed = u(ks[0], (H, E))
    b_embed = u(ks[1], (H,))
    w_ih = u(ks[2], (4 * H, 2))
    w_hh = u(ks[3], (4 * H, H))
    b_ih = u(ks[4], (4 * H,))
    b_hh = u(ks[5], (4 * H,))
    w_out = u(ks[6], (2, H))
    b_out = u(ks[7], (2,))
    w_stop = u(ks[8], (1, H))
    b_stop = u(ks[9], (1,))
    return {
        "we": w_embed.T,                        # (E, H)
        "be": b_embed.reshape(1, H),            # (1, H)
        "wih": w_ih.T,                          # (2, 4H)
        "whh": w_hh.T,                          # (H, 4H)
        "b": (b_ih + b_hh).reshape(1, 4 * H),   # (1, 4H)
        "wout": w_out.T,                        # (H, 2)
        "bout": b_out.reshape(1, 2),            # (1, 2)
        "wstop": w_stop.T,                      # (H, 1)
        "bstop": b_stop.reshape(1, 1),          # (1, 1)
    }


def _reference_full(embedding, params, T):
    """Pure numpy (float64) reference of the full-length decode."""
    f = lambda a: np.asarray(a, dtype=np.float64)
    emb, we, be = f(embedding), f(params["we"]), f(params["be"])
    wih, whh, b = f(params["wih"]), f(params["whh"]), f(params["b"])
    wout, bout = f(params["wout"]), f(params["bout"])
    wstop, bstop = f(params["wstop"]), f(params["bstop"])
    B, H = emb.shape[0], we.shape[1]
    sig = lambda z: 1.0 / (1.0 + np.exp(-z))

    h = emb @ we + be
    c = np.zeros((B, H))
    x = np.zeros((B, 2))
    coords = np.zeros((B, T, 2))
    stops = np.zeros((B, T, 1))
    for t in range(T):
        gates = x @ wih + h @ whh + b
        i_g = sig(gates[:, 0 * H:1 * H])
        f_g = sig(gates[:, 1 * H:2 * H])
        g_g = np.tanh(gates[:, 2 * H:3 * H])
        o_g = sig(gates[:, 3 * H:4 * H])
        c = f_g * c + i_g * g_g
        h = o_g * np.tanh(c)
        coord = h @ wout + bout
        stop = sig(h @ wstop + bstop)
        coords[:, t, :] = coord
        stops[:, t, :] = stop
        x = coord
    return coords.astype(np.float32), stops.astype(np.float32)


if __name__ == "__main__":
    B, E, H, T = 8, 32, 32, 8
    key = jax.random.PRNGKey(0)
    k_emb, k_par = jax.random.split(key)
    embedding = jax.random.normal(k_emb, (B, E), dtype=jnp.float32)
    params = init_params(k_par, E, H)

    coords_full, stops_full, t_eff = coordinate_decoder_full(
        embedding, params, max_seq_length=T)
    jax.block_until_ready(coords_full)
    jax.block_until_ready(stops_full)

    # Correctness check of the full-length decode against a numpy reference.
    ref_c, ref_s = _reference_full(embedding, params, T)
    assert np.allclose(np.asarray(coords_full), ref_c, atol=1e-3, rtol=1e-3)
    assert np.allclose(np.asarray(stops_full), ref_s, atol=1e-3, rtol=1e-3)
    assert 1 <= int(t_eff) <= T

    # PyTorch-exact (truncated) outputs.
    outputs, stop_probs = coordinate_decoder_pallas(embedding, params, T)
    assert outputs.shape[0] == B and outputs.shape[2] == 2
    assert stop_probs.shape[0] == B and stop_probs.shape[2] == 1
    assert outputs.shape[1] == stop_probs.shape[1] == int(t_eff)

    print("KERNEL_OK")
</pallas_src>

<mosaic_0001>
module attributes {stable_mosaic.version = 11 : i64} {
  func.func @_decoder_kernel(%arg0: memref<8x32xf32, #tpu.memory_space<vmem>>, %arg1: memref<72x256xf32, #tpu.memory_space<vmem>>, %arg2: memref<8x32xf32, #tpu.memory_space<vmem>>) attributes {dimension_semantics = [], scalar_prefetch = 0 : i64, scratch_operands = 0 : i64, tpu.core_type = #tpu.core_type<tc>} {
    %c0 = arith.constant 0 : index
    %c0_0 = arith.constant 0 : index
    %0 = vector.load %arg1[%c0, %c0_0] : memref<72x256xf32, #tpu.memory_space<vmem>>, vector<32x128xf32>
    %c32 = arith.constant 32 : index
    %c0_1 = arith.constant 0 : index
    %1 = vector.load %arg1[%c32, %c0_1] : memref<72x256xf32, #tpu.memory_space<vmem>>, vector<32x256xf32>
    %c64 = arith.constant 64 : index
    %c0_2 = arith.constant 0 : index
    %2 = vector.load %arg1[%c64, %c0_2] : memref<72x256xf32, #tpu.memory_space<vmem>>, vector<1x128xf32>
    %c65 = arith.constant 65 : index
    %c0_3 = arith.constant 0 : index
    %3 = vector.load %arg1[%c65, %c0_3] : memref<72x256xf32, #tpu.memory_space<vmem>>, vector<1x128xf32>
    %c66 = arith.constant 66 : index
    %c0_4 = arith.constant 0 : index
    %4 = vector.load %arg1[%c66, %c0_4] : memref<72x256xf32, #tpu.memory_space<vmem>>, vector<1x256xf32>
    %c67 = arith.constant 67 : index
    %c0_5 = arith.constant 0 : index
    %5 = vector.load %arg1[%c67, %c0_5] : memref<72x256xf32, #tpu.memory_space<vmem>>, vector<1x128xf32>
    %6 = tpu.iota {dimensions = array<i32: 1>} : vector<8x128xi32>
    %c64_i32 = arith.constant 64 : i32
    %7 = vector.broadcast %c64_i32 : i32 to vector<8x128xi32>
    %8 = arith.cmpi sge, %6, %7 : vector<8x128xi32>
    %c96_i32 = arith.constant 96 : i32
    %9 = vector.broadcast %c96_i32 : i32 to vector<8x128xi32>
    %10 = arith.cmpi slt, %6, %9 : vector<8x128xi32>
    %11 = arith.andi %8, %10 : vector<8x128xi1>
    %cst = arith.constant 2.000000e+00 : f32
    %cst_6 = arith.constant 1.000000e+00 : f32
    %12 = vector.broadcast %cst : f32 to vector<8x128xf32>
    %13 = vector.broadcast %cst_6 : f32 to vector<8x128xf32>
    %14 = arith.select %11, %12, %13 : vector<8x128xi1>, vector<8x128xf32>
    %15 = vector.shape_cast %2 : vector<1x128xf32> to vector<1x128xf32>
    %16 = vector.broadcast %15 : vector<1x128xf32> to vector<8x128xf32>
    %17 = vector.shape_cast %3 : vector<1x128xf32> to vector<1x128xf32>
    %18 = vector.broadcast %17 : vector<1x128xf32> to vector<8x128xf32>
    %19 = vector.shape_cast %4 : vector<1x256xf32> to vector<1x256xf32>
    %20 = vector.broadcast %19 : vector<1x256xf32> to vector<8x256xf32>
    %21 = vector.shape_cast %5 : vector<1x128xf32> to vector<1x128xf32>
    %22 = vector.broadcast %21 : vector<1x128xf32> to vector<8x128xf32>
    %c0_7 = arith.constant 0 : index
    %c0_8 = arith.constant 0 : index
    %23 = vector.load %arg0[%c0_7, %c0_8] : memref<8x32xf32, #tpu.memory_space<vmem>>, vector<8x32xf32>
    %cst_9 = arith.constant dense<0.000000e+00> : vector<8x128xf32>
    %24 = tpu.matmul %23, %0, %cst_9 {dimension_numbers = #tpu.dot_dimension_numbers<[1], [0], [0], [1], [0, 0, 1, 1], [], []>} : vector<8x32xf32>, vector<32x128xf32>, vector<8x128xf32> -> vector<8x128xf32>
    %25 = arith.addf %24, %22 : vector<8x128xf32>
    %cst_10 = arith.constant 0.000000e+00 : f32
    %26 = vector.broadcast %cst_10 : f32 to vector<8x32xf32>
    %27 = arith.mulf %25, %14 : vector<8x128xf32>
    %28 = arith.negf %27 : vector<8x128xf32>
    %29 = math.exp %28 : vector<8x128xf32>
    %cst_11 = arith.constant 1.000000e+00 : f32
    %30 = vector.broadcast %cst_11 : f32 to vector<8x128xf32>
    %31 = arith.addf %30, %29 : vector<8x128xf32>
    %32 = arith.divf %30, %31 : vector<8x128xf32>
    %33 = arith.addf %32, %32 : vector<8x128xf32>
    %cst_12 = arith.constant 1.000000e+00 : f32
    %34 = vector.broadcast %cst_12 : f32 to vector<8x128xf32>
    %35 = arith.subf %33, %34 : vector<8x128xf32>
    %36 = arith.select %11, %35, %32 : vector<8x128xi1>, vector<8x128xf32>
    %37 = vector.extract_strided_slice %36 {offsets = [0, 0], sizes = [8, 32], strides = [1, 1]} : vector<8x128xf32> to vector<8x32xf32>
    %38 = vector.extract_strided_slice %36 {offsets = [0, 32], sizes = [8, 32], strides = [1, 1]} : vector<8x128xf32> to vector<8x32xf32>
    %39 = vector.extract_strided_slice %36 {offsets = [0, 64], sizes = [8, 32], strides = [1, 1]} : vector<8x128xf32> to vector<8x32xf32>
    %40 = vector.extract_strided_slice %36 {offsets = [0, 96], sizes = [8, 32], strides = [1, 1]} : vector<8x128xf32> to vector<8x32xf32>
    %41 = arith.mulf %38, %26 : vector<8x32xf32>
    %42 = arith.mulf %37, %39 : vector<8x32xf32>
    %43 = arith.addf %41, %42 : vector<8x32xf32>
    %44 = math.tanh %43 : vector<8x32xf32>
    %45 = arith.mulf %40, %44 : vector<8x32xf32>
    %cst_13 = arith.constant dense<0.000000e+00> : vector<8x256xf32>
    %46 = tpu.matmul %45, %1, %cst_13 {dimension_numbers = #tpu.dot_dimension_numbers<[1], [0], [0], [1], [0, 0, 1, 1], [], []>} : vector<8x32xf32>, vector<32x256xf32>, vector<8x256xf32> -> vector<8x256xf32>
    %47 = arith.addf %46, %20 : vector<8x256xf32>
    %48 = vector.extract_strided_slice %47 {offsets = [0, 0], sizes = [8, 128], strides = [1, 1]} : vector<8x256xf32> to vector<8x128xf32>
    %49 = vector.extract_strided_slice %47 {offsets = [0, 128], sizes = [8, 4], strides = [1, 1]} : vector<8x256xf32> to vector<8x4xf32>
    %50 = vector.extract_strided_slice %49 {offsets = [0, 0], sizes = [8, 2], strides = [1, 1]} : vector<8x4xf32> to vector<8x2xf32>
    %51 = vector.extract_strided_slice %50 {offsets = [0, 0], sizes = [8, 1], strides = [1, 1]} : vector<8x2xf32> to vector<8x1xf32>
    %52 = vector.broadcast %51 : vector<8x1xf32> to vector<8x128xf32>
    %53 = arith.mulf %52, %16 : vector<8x128xf32>
    %54 = arith.addf %48, %53 : vector<8x128xf32>
    %55 = vector.extract_strided_slice %50 {offsets = [0, 1], sizes = [8, 1], strides = [1, 1]} : vector<8x2xf32> to vector<8x1xf32>
    %56 = vector.broadcast %55 : vector<8x1xf32> to vector<8x128xf32>
    %57 = arith.mulf %56, %18 : vector<8x128xf32>
    %58 = arith.addf %54, %57 : vector<8x128xf32>
    %59 = arith.mulf %58, %14 : vector<8x128xf32>
    %60 = arith.negf %59 : vector<8x128xf32>
    %61 = math.exp %60 : vector<8x128xf32>
    %cst_14 = arith.constant 1.000000e+00 : f32
    %62 = vector.broadcast %cst_14 : f32 to vector<8x128xf32>
    %63 = arith.addf %62, %61 : vector<8x128xf32>
    %64 = arith.divf %62, %63 : vector<8x128xf32>
    %65 = arith.addf %64, %64 : vector<8x128xf32>
    %cst_15 = arith.constant 1.000000e+00 : f32
    %66 = vector.broadcast %cst_15 : f32 to vector<8x128xf32>
    %67 = arith.subf %65, %66 : vector<8x128xf32>
    %68 = arith.select %11, %67, %64 : vector<8x128xi1>, vector<8x128xf32>
    %69 = vector.extract_strided_slice %68 {offsets = [0, 0], sizes = [8, 32], strides = [1, 1]} : vector<8x128xf32> to vector<8x32xf32>
    %70 = vector.extract_strided_slice %68 {offsets = [0, 32], sizes = [8, 32], strides = [1, 1]} : vector<8x128xf32> to vector<8x32xf32>
    %71 = vector.extract_strided_slice %68 {offsets = [0, 64], sizes = [8, 32], strides = [1, 1]} : vector<8x128xf32> to vector<8x32xf32>
    %72 = vector.extract_strided_slice %68 {offsets = [0, 96], sizes = [8, 32], strides = [1, 1]} : vector<8x128xf32> to vector<8x32xf32>
    %73 = arith.mulf %70, %43 : vector<8x32xf32>
    %74 = arith.mulf %69, %71 : vector<8x32xf32>
    %75 = arith.addf %73, %74 : vector<8x32xf32>
    %76 = math.tanh %75 : vector<8x32xf32>
    %77 = arith.mulf %72, %76 : vector<8x32xf32>
    %cst_16 = arith.constant dense<0.000000e+00> : vector<8x256xf32>
    %78 = tpu.matmul %77, %1, %cst_16 {dimension_numbers = #tpu.dot_dimension_numbers<[1], [0], [0], [1], [0, 0, 1, 1], [], []>} : vector<8x32xf32>, vector<32x256xf32>, vector<8x256xf32> -> vector<8x256xf32>
    %79 = arith.addf %78, %20 : vector<8x256xf32>
    %80 = vector.extract_strided_slice %79 {offsets = [0, 0], sizes = [8, 128], strides = [1, 1]} : vector<8x256xf32> to vector<8x128xf32>
    %81 = vector.extract_strided_slice %79 {offsets = [0, 128], sizes = [8, 4], strides = [1, 1]} : vector<8x256xf32> to vector<8x4xf32>
    %82 = vector.extract_strided_slice %81 {offsets = [0, 0], sizes = [8, 2], strides = [1, 1]} : vector<8x4xf32> to vector<8x2xf32>
    %83 = vector.extract_strided_slice %82 {offsets = [0, 0], sizes = [8, 1], strides = [1, 1]} : vector<8x2xf32> to vector<8x1xf32>
    %84 = vector.broadcast %83 : vector<8x1xf32> to vector<8x128xf32>
    %85 = arith.mulf %84, %16 : vector<8x128xf32>
    %86 = arith.addf %80, %85 : vector<8x128xf32>
    %87 = vector.extract_strided_slice %82 {offsets = [0, 1], sizes = [8, 1], strides = [1, 1]} : vector<8x2xf32> to vector<8x1xf32>
    %88 = vector.broadcast %87 : vector<8x1xf32> to vector<8x128xf32>
    %89 = arith.mulf %88, %18 : vector<8x128xf32>
    %90 = arith.addf %86, %89 : vector<8x128xf32>
    %91 = arith.mulf %90, %14 : vector<8x128xf32>
    %92 = arith.negf %91 : vector<8x128xf32>
    %93 = math.exp %92 : vector<8x128xf32>
    %cst_17 = arith.constant 1.000000e+00 : f32
    %94 = vector.broadcast %cst_17 : f32 to vector<8x128xf32>
    %95 = arith.addf %94, %93 : vector<8x128xf32>
    %96 = arith.divf %94, %95 : vector<8x128xf32>
    %97 = arith.addf %96, %96 : vector<8x128xf32>
    %cst_18 = arith.constant 1.000000e+00 : f32
    %98 = vector.broadcast %cst_18 : f32 to vector<8x128xf32>
    %99 = arith.subf %97, %98 : vector<8x128xf32>
    %100 = arith.select %11, %99, %96 : vector<8x128xi1>, vector<8x128xf32>
    %101 = vector.extract_strided_slice %100 {offsets = [0, 0], sizes = [8, 32], strides = [1, 1]} : vector<8x128xf32> to vector<8x32xf32>
    %102 = vector.extract_strided_slice %100 {offsets = [0, 32], sizes = [8, 32], strides = [1, 1]} : vector<8x128xf32> to vector<8x32xf32>
    %103 = vector.extract_strided_slice %100 {offsets = [0, 64], sizes = [8, 32], strides = [1, 1]} : vector<8x128xf32> to vector<8x32xf32>
    %104 = vector.extract_strided_slice %100 {offsets = [0, 96], sizes = [8, 32], strides = [1, 1]} : vector<8x128xf32> to vector<8x32xf32>
    %105 = arith.mulf %102, %75 : vector<8x32xf32>
    %106 = arith.mulf %101, %103 : vector<8x32xf32>
    %107 = arith.addf %105, %106 : vector<8x32xf32>
    %108 = math.tanh %107 : vector<8x32xf32>
    %109 = arith.mulf %104, %108 : vector<8x32xf32>
    %cst_19 = arith.constant dense<0.000000e+00> : vector<8x256xf32>
    %110 = tpu.matmul %109, %1, %cst_19 {dimension_numbers = #tpu.dot_dimension_numbers<[1], [0], [0], [1], [0, 0, 1, 1], [], []>} : vector<8x32xf32>, vector<32x256xf32>, vector<8x256xf32> -> vector<8x256xf32>
    %111 = arith.addf %110, %20 : vector<8x256xf32>
    %112 = vector.extract_strided_slice %111 {offsets = [0, 0], sizes = [8, 128], strides = [1, 1]} : vector<8x256xf32> to vector<8x128xf32>
    %113 = vector.extract_strided_slice %111 {offsets = [0, 128], sizes = [8, 4], strides = [1, 1]} : vector<8x256xf32> to vector<8x4xf32>
    %114 = vector.extract_strided_slice %113 {offsets = [0, 0], sizes = [8, 2], strides = [1, 1]} : vector<8x4xf32> to vector<8x2xf32>
    %115 = vector.extract_strided_slice %114 {offsets = [0, 0], sizes = [8, 1], strides = [1, 1]} : vector<8x2xf32> to vector<8x1xf32>
    %116 = vector.broadcast %115 : vector<8x1xf32> to vector<8x128xf32>
    %117 = arith.mulf %116, %16 : vector<8x128xf32>
    %118 = arith.addf %112, %117 : vector<8x128xf32>
    %119 = vector.extract_strided_slice %114 {offsets = [0, 1], sizes = [8, 1], strides = [1, 1]} : vector<8x2xf32> to vector<8x1xf32>
    %120 = vector.broadcast %119 : vector<8x1xf32> to vector<8x128xf32>
    %121 = arith.mulf %120, %18 : vector<8x128xf32>
    %122 = arith.addf %118, %121 : vector<8x128xf32>
    %123 = arith.mulf %122, %14 : vector<8x128xf32>
    %124 = arith.negf %123 : vector<8x128xf32>
    %125 = math.exp %124 : vector<8x128xf32>
    %cst_20 = arith.constant 1.000000e+00 : f32
    %126 = vector.broadcast %cst_20 : f32 to vector<8x128xf32>
    %127 = arith.addf %126, %125 : vector<8x128xf32>
    %128 = arith.divf %126, %127 : vector<8x128xf32>
    %129 = arith.addf %128, %128 : vector<8x128xf32>
    %cst_21 = arith.constant 1.000000e+00 : f32
    %130 = vector.broadcast %cst_21 : f32 to vector<8x128xf32>
    %131 = arith.subf %129, %130 : vector<8x128xf32>
    %132 = arith.select %11, %131, %128 : vector<8x128xi1>, vector<8x128xf32>
    %133 = vector.extract_strided_slice %132 {offsets = [0, 0], sizes = [8, 32], strides = [1, 1]} : vector<8x128xf32> to vector<8x32xf32>
    %134 = vector.extract_strided_slice %132 {offsets = [0, 32], sizes = [8, 32], strides = [1, 1]} : vector<8x128xf32> to vector<8x32xf32>
    %135 = vector.extract_strided_slice %132 {offsets = [0, 64], sizes = [8, 32], strides = [1, 1]} : vector<8x128xf32> to vector<8x32xf32>
    %136 = vector.extract_strided_slice %132 {offsets = [0, 96], sizes = [8, 32], strides = [1, 1]} : vector<8x128xf32> to vector<8x32xf32>
    %137 = arith.mulf %134, %107 : vector<8x32xf32>
    %138 = arith.mulf %133, %135 : vector<8x32xf32>
    %139 = arith.addf %137, %138 : vector<8x32xf32>
    %140 = math.tanh %139 : vector<8x32xf32>
    %141 = arith.mulf %136, %140 : vector<8x32xf32>
    %cst_22 = arith.constant dense<0.000000e+00> : vector<8x256xf32>
    %142 = tpu.matmul %141, %1, %cst_22 {dimension_numbers = #tpu.dot_dimension_numbers<[1], [0], [0], [1], [0, 0, 1, 1], [], []>} : vector<8x32xf32>, vector<32x256xf32>, vector<8x256xf32> -> vector<8x256xf32>
    %143 = arith.addf %142, %20 : vector<8x256xf32>
    %144 = vector.extract_strided_slice %143 {offsets = [0, 0], sizes = [8, 128], strides = [1, 1]} : vector<8x256xf32> to vector<8x128xf32>
    %145 = vector.extract_strided_slice %143 {offsets = [0, 128], sizes = [8, 4], strides = [1, 1]} : vector<8x256xf32> to vector<8x4xf32>
    %146 = vector.extract_strided_slice %145 {offsets = [0, 0], sizes = [8, 2], strides = [1, 1]} : vector<8x4xf32> to vector<8x2xf32>
    %147 = vector.extract_strided_slice %146 {offsets = [0, 0], sizes = [8, 1], strides = [1, 1]} : vector<8x2xf32> to vector<8x1xf32>
    %148 = vector.broadcast %147 : vector<8x1xf32> to vector<8x128xf32>
    %149 = arith.mulf %148, %16 : vector<8x128xf32>
    %150 = arith.addf %144, %149 : vector<8x128xf32>
    %151 = vector.extract_strided_slice %146 {offsets = [0, 1], sizes = [8, 1], strides = [1, 1]} : vector<8x2xf32> to vector<8x1xf32>
    %152 = vector.broadcast %151 : vector<8x1xf32> to vector<8x128xf32>
    %153 = arith.mulf %152, %18 : vector<8x128xf32>
    %154 = arith.addf %150, %153 : vector<8x128xf32>
    %155 = arith.mulf %154, %14 : vector<8x128xf32>
    %156 = arith.negf %155 : vector<8x128xf32>
    %157 = math.exp %156 : vector<8x128xf32>
    %cst_23 = arith.constant 1.000000e+00 : f32
    %158 = vector.broadcast %cst_23 : f32 to vector<8x128xf32>
    %159 = arith.addf %158, %157 : vector<8x128xf32>
    %160 = arith.divf %158, %159 : vector<8x128xf32>
    %161 = arith.addf %160, %160 : vector<8x128xf32>
    %cst_24 = arith.constant 1.000000e+00 : f32
    %162 = vector.broadcast %cst_24 : f32 to vector<8x128xf32>
    %163 = arith.subf %161, %162 : vector<8x128xf32>
    %164 = arith.select %11, %163, %160 : vector<8x128xi1>, vector<8x128xf32>
    %165 = vector.extract_strided_slice %164 {offsets = [0, 0], sizes = [8, 32], strides = [1, 1]} : vector<8x128xf32> to vector<8x32xf32>
    %166 = vector.extract_strided_slice %164 {offsets = [0, 32], sizes = [8, 32], strides = [1, 1]} : vector<8x128xf32> to vector<8x32xf32>
    %167 = vector.extract_strided_slice %164 {offsets = [0, 64], sizes = [8, 32], strides = [1, 1]} : vector<8x128xf32> to vector<8x32xf32>
    %168 = vector.extract_strided_slice %164 {offsets = [0, 96], sizes = [8, 32], strides = [1, 1]} : vector<8x128xf32> to vector<8x32xf32>
    %169 = arith.mulf %166, %139 : vector<8x32xf32>
    %170 = arith.mulf %165, %167 : vector<8x32xf32>
    %171 = arith.addf %169, %170 : vector<8x32xf32>
    %172 = math.tanh %171 : vector<8x32xf32>
    %173 = arith.mulf %168, %172 : vector<8x32xf32>
    %cst_25 = arith.constant dense<0.000000e+00> : vector<8x256xf32>
    %174 = tpu.matmul %173, %1, %cst_25 {dimension_numbers = #tpu.dot_dimension_numbers<[1], [0], [0], [1], [0, 0, 1, 1], [], []>} : vector<8x32xf32>, vector<32x256xf32>, vector<8x256xf32> -> vector<8x256xf32>
    %175 = arith.addf %174, %20 : vector<8x256xf32>
    %176 = vector.extract_strided_slice %175 {offsets = [0, 0], sizes = [8, 128], strides = [1, 1]} : vector<8x256xf32> to vector<8x128xf32>
    %177 = vector.extract_strided_slice %175 {offsets = [0, 128], sizes = [8, 4], strides = [1, 1]} : vector<8x256xf32> to vector<8x4xf32>
    %178 = vector.extract_strided_slice %177 {offsets = [0, 0], sizes = [8, 2], strides = [1, 1]} : vector<8x4xf32> to vector<8x2xf32>
    %179 = vector.extract_strided_slice %178 {offsets = [0, 0], sizes = [8, 1], strides = [1, 1]} : vector<8x2xf32> to vector<8x1xf32>
    %180 = vector.broadcast %179 : vector<8x1xf32> to vector<8x128xf32>
    %181 = arith.mulf %180, %16 : vector<8x128xf32>
    %182 = arith.addf %176, %181 : vector<8x128xf32>
    %183 = vector.extract_strided_slice %178 {offsets = [0, 1], sizes = [8, 1], strides = [1, 1]} : vector<8x2xf32> to vector<8x1xf32>
    %184 = vector.broadcast %183 : vector<8x1xf32> to vector<8x128xf32>
    %185 = arith.mulf %184, %18 : vector<8x128xf32>
    %186 = arith.addf %182, %185 : vector<8x128xf32>
    %187 = arith.mulf %186, %14 : vector<8x128xf32>
    %188 = arith.negf %187 : vector<8x128xf32>
    %189 = math.exp %188 : vector<8x128xf32>
    %cst_26 = arith.constant 1.000000e+00 : f32
    %190 = vector.broadcast %cst_26 : f32 to vector<8x128xf32>
    %191 = arith.addf %190, %189 : vector<8x128xf32>
    %192 = arith.divf %190, %191 : vector<8x128xf32>
    %193 = arith.addf %192, %192 : vector<8x128xf32>
    %cst_27 = arith.constant 1.000000e+00 : f32
    %194 = vector.broadcast %cst_27 : f32 to vector<8x128xf32>
    %195 = arith.subf %193, %194 : vector<8x128xf32>
    %196 = arith.select %11, %195, %192 : vector<8x128xi1>, vector<8x128xf32>
    %197 = vector.extract_strided_slice %196 {offsets = [0, 0], sizes = [8, 32], strides = [1, 1]} : vector<8x128xf32> to vector<8x32xf32>
    %198 = vector.extract_strided_slice %196 {offsets = [0, 32], sizes = [8, 32], strides = [1, 1]} : vector<8x128xf32> to vector<8x32xf32>
    %199 = vector.extract_strided_slice %196 {offsets = [0, 64], sizes = [8, 32], strides = [1, 1]} : vector<8x128xf32> to vector<8x32xf32>
    %200 = vector.extract_strided_slice %196 {offsets = [0, 96], sizes = [8, 32], strides = [1, 1]} : vector<8x128xf32> to vector<8x32xf32>
    %201 = arith.mulf %198, %171 : vector<8x32xf32>
    %202 = arith.mulf %197, %199 : vector<8x32xf32>
    %203 = arith.addf %201, %202 : vector<8x32xf32>
    %204 = math.tanh %203 : vector<8x32xf32>
    %205 = arith.mulf %200, %204 : vector<8x32xf32>
    %cst_28 = arith.constant dense<0.000000e+00> : vector<8x256xf32>
    %206 = tpu.matmul %205, %1, %cst_28 {dimension_numbers = #tpu.dot_dimension_numbers<[1], [0], [0], [1], [0, 0, 1, 1], [], []>} : vector<8x32xf32>, vector<32x256xf32>, vector<8x256xf32> -> vector<8x256xf32>
    %207 = arith.addf %206, %20 : vector<8x256xf32>
    %208 = vector.extract_strided_slice %207 {offsets = [0, 0], sizes = [8, 128], strides = [1, 1]} : vector<8x256xf32> to vector<8x128xf32>
    %209 = vector.extract_strided_slice %207 {offsets = [0, 128], sizes = [8, 4], strides = [1, 1]} : vector<8x256xf32> to vector<8x4xf32>
    %210 = vector.extract_strided_slice %209 {offsets = [0, 0], sizes = [8, 2], strides = [1, 1]} : vector<8x4xf32> to vector<8x2xf32>
    %211 = vector.extract_strided_slice %210 {offsets = [0, 0], sizes = [8, 1], strides = [1, 1]} : vector<8x2xf32> to vector<8x1xf32>
    %212 = vector.broadcast %211 : vector<8x1xf32> to vector<8x128xf32>
    %213 = arith.mulf %212, %16 : vector<8x128xf32>
    %214 = arith.addf %208, %213 : vector<8x128xf32>
    %215 = vector.extract_strided_slice %210 {offsets = [0, 1], sizes = [8, 1], strides = [1, 1]} : vector<8x2xf32> to vector<8x1xf32>
    %216 = vector.broadcast %215 : vector<8x1xf32> to vector<8x128xf32>
    %217 = arith.mulf %216, %18 : vector<8x128xf32>
    %218 = arith.addf %214, %217 : vector<8x128xf32>
    %219 = arith.mulf %218, %14 : vector<8x128xf32>
    %220 = arith.negf %219 : vector<8x128xf32>
    %221 = math.exp %220 : vector<8x128xf32>
    %cst_29 = arith.constant 1.000000e+00 : f32
    %222 = vector.broadcast %cst_29 : f32 to vector<8x128xf32>
    %223 = arith.addf %222, %221 : vector<8x128xf32>
    %224 = arith.divf %222, %223 : vector<8x128xf32>
    %225 = arith.addf %224, %224 : vector<8x128xf32>
    %cst_30 = arith.constant 1.000000e+00 : f32
    %226 = vector.broadcast %cst_30 : f32 to vector<8x128xf32>
    %227 = arith.subf %225, %226 : vector<8x128xf32>
    %228 = arith.select %11, %227, %224 : vector<8x128xi1>, vector<8x128xf32>
    %229 = vector.extract_strided_slice %228 {offsets = [0, 0], sizes = [8, 32], strides = [1, 1]} : vector<8x128xf32> to vector<8x32xf32>
    %230 = vector.extract_strided_slice %228 {offsets = [0, 32], sizes = [8, 32], strides = [1, 1]} : vector<8x128xf32> to vector<8x32xf32>
    %231 = vector.extract_strided_slice %228 {offsets = [0, 64], sizes = [8, 32], strides = [1, 1]} : vector<8x128xf32> to vector<8x32xf32>
    %232 = vector.extract_strided_slice %228 {offsets = [0, 96], sizes = [8, 32], strides = [1, 1]} : vector<8x128xf32> to vector<8x32xf32>
    %233 = arith.mulf %230, %203 : vector<8x32xf32>
    %234 = arith.mulf %229, %231 : vector<8x32xf32>
    %235 = arith.addf %233, %234 : vector<8x32xf32>
    %236 = math.tanh %235 : vector<8x32xf32>
    %237 = arith.mulf %232, %236 : vector<8x32xf32>
    %cst_31 = arith.constant dense<0.000000e+00> : vector<8x256xf32>
    %238 = tpu.matmul %237, %1, %cst_31 {dimension_numbers = #tpu.dot_dimension_numbers<[1], [0], [0], [1], [0, 0, 1, 1], [], []>} : vector<8x32xf32>, vector<32x256xf32>, vector<8x256xf32> -> vector<8x256xf32>
    %239 = arith.addf %238, %20 : vector<8x256xf32>
    %240 = vector.extract_strided_slice %239 {offsets = [0, 0], sizes = [8, 128], strides = [1, 1]} : vector<8x256xf32> to vector<8x128xf32>
    %241 = vector.extract_strided_slice %239 {offsets = [0, 128], sizes = [8, 4], strides = [1, 1]} : vector<8x256xf32> to vector<8x4xf32>
    %242 = vector.extract_strided_slice %241 {offsets = [0, 0], sizes = [8, 2], strides = [1, 1]} : vector<8x4xf32> to vector<8x2xf32>
    %243 = vector.extract_strided_slice %242 {offsets = [0, 0], sizes = [8, 1], strides = [1, 1]} : vector<8x2xf32> to vector<8x1xf32>
    %244 = vector.broadcast %243 : vector<8x1xf32> to vector<8x128xf32>
    %245 = arith.mulf %244, %16 : vector<8x128xf32>
    %246 = arith.addf %240, %245 : vector<8x128xf32>
    %247 = vector.extract_strided_slice %242 {offsets = [0, 1], sizes = [8, 1], strides = [1, 1]} : vector<8x2xf32> to vector<8x1xf32>
    %248 = vector.broadcast %247 : vector<8x1xf32> to vector<8x128xf32>
    %249 = arith.mulf %248, %18 : vector<8x128xf32>
    %250 = arith.addf %246, %249 : vector<8x128xf32>
    %251 = arith.mulf %250, %14 : vector<8x128xf32>
    %252 = arith.negf %251 : vector<8x128xf32>
    %253 = math.exp %252 : vector<8x128xf32>
    %cst_32 = arith.constant 1.000000e+00 : f32
    %254 = vector.broadcast %cst_32 : f32 to vector<8x128xf32>
    %255 = arith.addf %254, %253 : vector<8x128xf32>
    %256 = arith.divf %254, %255 : vector<8x128xf32>
    %257 = arith.addf %256, %256 : vector<8x128xf32>
    %cst_33 = arith.constant 1.000000e+00 : f32
    %258 = vector.broadcast %cst_33 : f32 to vector<8x128xf32>
    %259 = arith.subf %257, %258 : vector<8x128xf32>
    %260 = arith.select %11, %259, %256 : vector<8x128xi1>, vector<8x128xf32>
    %261 = vector.extract_strided_slice %260 {offsets = [0, 0], sizes = [8, 32], strides = [1, 1]} : vector<8x128xf32> to vector<8x32xf32>
    %262 = vector.extract_strided_slice %260 {offsets = [0, 32], sizes = [8, 32], strides = [1, 1]} : vector<8x128xf32> to vector<8x32xf32>
    %263 = vector.extract_strided_slice %260 {offsets = [0, 64], sizes = [8, 32], strides = [1, 1]} : vector<8x128xf32> to vector<8x32xf32>
    %264 = vector.extract_strided_slice %260 {offsets = [0, 96], sizes = [8, 32], strides = [1, 1]} : vector<8x128xf32> to vector<8x32xf32>
    %265 = arith.mulf %262, %235 : vector<8x32xf32>
    %266 = arith.mulf %261, %263 : vector<8x32xf32>
    %267 = arith.addf %265, %266 : vector<8x32xf32>
    %268 = math.tanh %267 : vector<8x32xf32>
    %269 = arith.mulf %264, %268 : vector<8x32xf32>
    %cst_34 = arith.constant dense<0.000000e+00> : vector<8x256xf32>
    %270 = tpu.matmul %269, %1, %cst_34 {dimension_numbers = #tpu.dot_dimension_numbers<[1], [0], [0], [1], [0, 0, 1, 1], [], []>} : vector<8x32xf32>, vector<32x256xf32>, vector<8x256xf32> -> vector<8x256xf32>
    %271 = arith.addf %270, %20 : vector<8x256xf32>
    %272 = vector.extract_strided_slice %271 {offsets = [0, 128], sizes = [8, 4], strides = [1, 1]} : vector<8x256xf32> to vector<8x4xf32>
    %273 = tpu.concatenate %49, %81, %113, %145, %177, %209, %241, %272 in 1 : vector<8x4xf32>, vector<8x4xf32>, vector<8x4xf32>, vector<8x4xf32>, vector<8x4xf32>, vector<8x4xf32>, vector<8x4xf32>, vector<8x4xf32> -> vector<8x32xf32>
    %274 = tpu.iota {dimensions = array<i32: 1>} : vector<8x32xi32>
    %c4_i32 = arith.constant 4 : i32
    %c0_i32 = arith.constant 0 : i32
    %275 = arith.cmpi eq, %c4_i32, %c0_i32 : i32
    %c1_i32 = arith.constant 1 : i32
    %276 = arith.select %275, %c1_i32, %c4_i32 : i32
    %277 = vector.broadcast %276 : i32 to vector<8x32xi32>
    %278 = arith.remsi %274, %277 : vector<8x32xi32>
    %c0_i32_35 = arith.constant 0 : i32
    %279 = vector.broadcast %c0_i32_35 : i32 to vector<8x32xi32>
    %280 = arith.cmpi ne, %278, %279 : vector<8x32xi32>
    %c0_i32_36 = arith.constant 0 : i32
    %281 = vector.broadcast %c0_i32_36 : i32 to vector<8x32xi32>
    %282 = arith.cmpi slt, %278, %281 : vector<8x32xi32>
    %c0_i32_37 = arith.constant 0 : i32
    %283 = arith.cmpi slt, %276, %c0_i32_37 : i32
    %284 = vector.broadcast %283 : i1 to vector<8x32xi1>
    %285 = vector.broadcast %284 : vector<8x32xi1> to vector<8x32xi1>
    %286 = arith.xori %282, %285 : vector<8x32xi1>
    %287 = arith.andi %286, %280 : vector<8x32xi1>
    %288 = vector.broadcast %276 : i32 to vector<8x32xi32>
    %289 = arith.addi %278, %288 : vector<8x32xi32>
    %290 = arith.select %287, %289, %278 : vector<8x32xi1>, vector<8x32xi32>
    %c2_i32 = arith.constant 2 : i32
    %291 = vector.broadcast %c2_i32 : i32 to vector<8x32xi32>
    %292 = arith.cmpi eq, %290, %291 : vector<8x32xi32>
    %293 = arith.negf %273 : vector<8x32xf32>
    %294 = math.exp %293 : vector<8x32xf32>
    %cst_38 = arith.constant 1.000000e+00 : f32
    %295 = vector.broadcast %cst_38 : f32 to vector<8x32xf32>
    %296 = arith.addf %295, %294 : vector<8x32xf32>
    %297 = arith.divf %295, %296 : vector<8x32xf32>
    %298 = arith.select %292, %297, %273 : vector<8x32xi1>, vector<8x32xf32>
    %c0_39 = arith.constant 0 : index
    %c0_40 = arith.constant 0 : index
    %299 = vector.load %arg2[%c0_39, %c0_40] : memref<8x32xf32, #tpu.memory_space<vmem>>, vector<8x32xf32>
    tpu.vector_store %arg2[%c0_39, %c0_40], %298 {strides = array<i32>} : memref<8x32xf32, #tpu.memory_space<vmem>>, vector<8x32xf32>,
    return
  }
}

</mosaic_0001>

<bundles_post_ra>
// kernel: coordinate_decoder_full.1
= control target key start
LH: loop header
LB: loop body
LE: loop exit
PB: predicated region body
PF: predicated region fallthrough
CT: control target
= control target key end

     0   :  { %v1219_v0 = vmov 0.0   ;;  %vm1220_vm0 = vmmov 0   ;;  %vm46_vm1 = vcmask 261120   ;;  %v28_v6 = vlaneseq  ;;  %s1222_s20 = smov 64   ;;  %s1223_s21 = smov 32   ;;  %s1560_s1 = inlined_call_operand.vmem [shape: f32[72,256], index: 1, kind: input, shape index: {}]   ;;  %s1561_s0 = inlined_call_operand.vmem [shape: f32[8,32], index: 0, kind: input, shape index: {}]   ;;  %s1562_s2 = inlined_call_operand.vmem [shape: f32[8,32], index: 2, kind: output, shape index: {}]  }
   0x1   :  { %1127 = vmatprep.subr.mxu0 %v1219_v0  ;;  %v14_v1 = vld [vmem:[%s1560_s1 + $0x30] sm:$0xff]  ;;  %v13_v2 = vld [vmem:[%s1560_s1 + $0x20] sm:$0xff]  ;;  %1135 = vmatprep.mubr.msk.f32.mxu0 %vm1220_vm0, %v1219_v0  ;;  %v1221_v10 = vmov 1.0   ;;  %v1297_v28 = vld [vmem:[%s1560_s1 + $0x78] sm:$0xff]  ;;  %v1224_v44 = vmov 1   ;;  %v1225_v45 = vmov 0  }
   0x2   :  { %1128 = vmatpush3.msra.mxu0 %v14_v1  ;;  %216 = vmatprep.mubr.f32.mxu1 %v1219_v0  ;;  %v12_v3 = vld [vmem:[%s1560_s1 + $0x10] sm:$0xff]  ;;  %v11_v4 = vld [vmem:[%s1560_s1] sm:$0xff]  ;;  %v1271_v7 = vand.u32 127, %v28_v6  ;;  %v1307_v30 = vld [vmem:[%s1560_s1 + $0x68] sm:$0xff]  ;;  %v36_v37 = vshrl.u32 %v28_v6, 7  ;;  %s1227_s16 = smov 12  }
   0x3   :  { %1129 = vmatprep.subr.mxu0 %v1219_v0  ;;  %v45_v5 = vld [vmem:[%s1561_s0] sm:$0xff]  ;;  %v1302_v29 = vld [vmem:[%s1560_s1 + $0x70] sm:$0xff]  ;;  %176 = vmatprep.subr.mxu1 %v1297_v28  ;;  %v1320_v32 = vld [vmem:[%s1560_s1 + $0x58] sm:$0xff]  ;;  %s1228_s17 = smov 20   ;;  %s1229_s18 = smov 8   ;;  %vm1056_vm5 = vcmask 31744  }
   0x4   :  { %1130 = vmatpush3.msra.mxu0 %v13_v2  ;;  %vm30_vm2 = vcmp.ge.s32.totalorder %v1271_v7, 64  ;;  %vm31_vm3 = vcmp.lt.s32.totalorder %v1271_v7, 96  ;;  %v27_v9 = vld [vmem:[%s1560_s1 + $0x83] ss:$0 sm:$0xff]  ;;  %177 = vmatpush1.msra.mxu1 %v1302_v29  ;;  %v1327_v33 = vld [vmem:[%s1560_s1 + $0x50] sm:$0xff]  ;;  %v1334_v34 = vld [vmem:[%s1560_s1 + $0x48] sm:$0xff] }
   0x5   :  { %1131 = vmatprep.subr.mxu0 %v1219_v0  ;;  %vm1275_vm4 = vmand %vm30_vm2, %vm31_vm3  ;;  %v1313_v31 = vld [vmem:[%s1560_s1 + $0x60] sm:$0xff]  ;;  %178 = vmatprep.subr.mxu1 %v1307_v30  ;;  %v37_v39 = vsub.s32 0, %v36_v37  ;;  %v41_v46 = vsub.s32 1, %v36_v37  ;;  %s1230_s0 = smov 16   ;;  %s1231_s19 = smov 24   ;;  %vm1058_vm6 = vcmask 64512  }
   0x6   :  { %1132 = vmatpush3.msra.mxu0 %v12_v3  ;;  %v1284_v11 = vsel %vm1275_vm4, 2.0, %v1221_v10  ;;  %179 = vmatpush1.msra.mxu1 %v1313_v31  ;;  %v1341_v35 = vld [vmem:[%s1560_s1 + $0x40] sm:$0xff]  ;;  %vm1060_vm7 = vcmask 97280   ;;  %vm1062_vm8 = vcmask 130048   ;;  %vm1064_vm9 = vcmask 162816  }
   0x7   :  { %1133 = vmatprep.subr.mxu0 %v1219_v0  ;;  %180 = vmatprep.subr.mxu1 %v1320_v32  ;;  %v1095_v38 = vld [vmem:[%s1560_s1 + $0x82] ss:$8 sm:$0x3]  ;;  %v1383_v51 = vld [vmem:[%s1560_s1 + $0x80] ss:$0 sm:$0xff]  ;;  %vm1066_vm10 = vcmask 195584  }
   0x8   :  { %1134 = vmatpush3.msra.mxu0 %v11_v4  ;;  %181 = vmatpush1.msra.mxu1 %v1327_v33  ;;  %v1356_v40 = vrot.slane %v1095_v38, %v37_v39  ;;  %v1371_v47 = vrot.slane %v1095_v38, %v41_v46  ;;  %v1388_v52 = vld [vmem:[%s1560_s1 + $0x81] ss:$0 sm:$0xff]  ;;  %s1226_s1 = smov 4   ;;  %vm1068_vm11 = vcmask 228352  }
   0x9   :  { %1136 = vmatmul.mubr.msk.f32.vlgmr.msra.gmra.mxu0 %vm46_vm1, %v45_v5  ;;  %292 = vmatprep.subr.mxu0 %v1297_v28 }
   0xa   :  { %332 = vmatprep.mubr.f32.mxu0 %v1219_v0  ;;  %293 = vmatpush1.msra.mxu0 %v1302_v29 }
   0xb   :  { %294 = vmatprep.subr.mxu0 %v1307_v30  ;;  %182 = vmatprep.subr.mxu1 %v1334_v34 }
   0xc   :  { %295 = vmatpush1.msra.mxu0 %v1313_v31  ;;  %183 = vmatpush1.msra.mxu1 %v1341_v35 }
   0xd   :  { %296 = vmatprep.subr.mxu0 %v1320_v32  ;;  %408 = vmatprep.subr.mxu1 %v1297_v28 }
   0xe   :  { %297 = vmatpush1.msra.mxu0 %v1327_v33  ;;  %1153 = vset.pattern.permute.xlu1 %v1224_v44 }
   0xf   :  { %298 = vmatprep.subr.mxu0 %v1334_v34  ;;  %1152 = vset.pattern.permute.xlu0 %v1225_v45 }
  0x10   :  { %299 = vmatpush1.msra.mxu0 %v1341_v35 }
  0x11   :  { %524 = vmatprep.subr.mxu0 %v1297_v28 }
  0xc9   :  { %v116_v12 = vpop.f32.mrf.mxu0 }
  0xca   :  { %v117_v13 = vadd.f32 %v116_v12, %v27_v9 }
  0xcb   :  { %v1137_v14 = vpop.f32.mrf.mxu0 }
  0xcc   :  { %v120_v15 = vmul.f32 %v117_v13, %v1284_v11 }
  0xce   :  { %v1097_v16 = vmul.f32 -1.442695, %v120_v15 }
  0xd0   :  { %1167 = vpow2.f32 %v1097_v16 }
  0xdd   :  { %v1168_v17 = vpop.eup %1167 }
  0xde   :  { %v124_v18 = vadd.f32 1.0, %v1168_v17 }
  0xe0   :  { %1169 = vrcp.f32 %v124_v18 }
  0xed   :  { %v1170_v19 = vpop.eup %1169 }
  0xee   :  { %v127_v20 = vadd.f32 %v1170_v19, %v1170_v19 }
  0xf0   :  { %v1098_v21 = vadd.f32 -1.0, %v127_v20 }
  0xf2   :  { %v129_v22 = vsel %vm1275_vm4, %v1098_v21, %v1170_v19 }
  0xf3   :  { %132 = vrot.lane.b32.xlu0 %v129_v22, %s1222_s20  ;;  %v130_v25 = vmul.f32 0.0, %v129_v22 }
 0x165   :  { %v133_v23 = vpop.permute.xlu0 %132 }
 0x166   :  { %v135_v24 = vmul.f32 %v133_v23, %v129_v22 }
 0x168   :  { %137 = vrot.lane.b32.xlu0 %v135_v24, %s1223_s21 }
 0x1da   :  { %v138_v26 = vpop.permute.xlu0 %137 }
 0x1db   :  { %v1291_v27 = vadd.f32 %v138_v26, %v130_v25 }
 0x1dd   :  { %1171 = vtanh.f32 %v1291_v27 }
 0x1ea   :  { %v1172_v36 = vpop.eup %1171 }
 0x1eb   :  { %143 = vrot.lane.b32.xlu1 %v1172_v36, %s1222_s20 }
 0x25d   :  { %v144_v41 = vpop.permute.xlu1 %143 }
 0x25e   :  { %v146_v42 = vmul.f32 %v144_v41, %v129_v22 }
 0x260   :  { %148 = vrot.lane.b32.xlu1 %v146_v42, %s1223_s21 }
 0x2d2   :  { %v149_v43 = vpop.permute.xlu1 %148 }
 0x2d3   :  { %1099 = vmatmul.mubr.msk.f32.vlgmr.msra.gmra.mxu1 %vm46_vm1, %v149_v43 }
 0x2d4   :  { %409 = vmatpush1.msra.mxu1 %v1302_v29  ;;  %448 = vmatprep.mubr.f32.mxu1 %v1219_v0 }
 0x2d5   :  { %410 = vmatprep.subr.mxu1 %v1307_v30 }
 0x2d6   :  { %411 = vmatpush1.msra.mxu1 %v1313_v31 }
 0x2d7   :  { %412 = vmatprep.subr.mxu1 %v1320_v32 }
 0x2d8   :  { %413 = vmatpush1.msra.mxu1 %v1327_v33 }
 0x2d9   :  { %414 = vmatprep.subr.mxu1 %v1334_v34 }
 0x2da   :  { %415 = vmatpush1.msra.mxu1 %v1341_v35 }
 0x2db   :  { %640 = vmatprep.subr.mxu1 %v1297_v28 }
 0x393   :  { %v218_v48 = vpop.f32.mrf.mxu1 }
 0x394   :  { %v219_v55 = vadd.f32 %v218_v48, %v1356_v40 }
 0x395   :  { %v220_v49 = vpop.f32.mrf.mxu1 }
 0x396   :  { %v1374_v50 = vadd.f32 %v220_v49, %v1371_v47 }
 0x398   :  { %231 = vperm.xlu1 %1153, %v1374_v50   ;;  %225 = vperm.xlu0 %1152, %v1374_v50  }
 0x39c   :  { %1154 = vset.pattern.permute.xlu1 %v1225_v45  ;;  %1155 = vset.pattern.permute.xlu0 %v1224_v44 }
 0x413   :  { %v232_v53 = vpop.permute.xlu1 %231  ;;  %v226_v54 = vpop.permute.xlu0 %225 }
 0x414   :  { %v228_v56 = vmul.f32 %v226_v54, %v1383_v51  ;;  %v234_v57 = vmul.f32 %v232_v53, %v1388_v52 }
 0x416   :  { %v229_v58 = vadd.f32 %v228_v56, %v219_v55 }
 0x418   :  { %v235_v59 = vadd.f32 %v234_v57, %v229_v58 }
 0x41a   :  { %v236_v60 = vmul.f32 %v235_v59, %v1284_v11 }
 0x41c   :  { %v1100_v61 = vmul.f32 -1.442695, %v236_v60 }
 0x41e   :  { %1173 = vpow2.f32 %v1100_v61 }
 0x42b   :  { %v1174_v62 = vpop.eup %1173 }
 0x42c   :  { %v240_v63 = vadd.f32 1.0, %v1174_v62 }
 0x42e   :  { %1175 = vrcp.f32 %v240_v63 }
 0x43b   :  { %v1176_v1 = vpop.eup %1175 }
 0x43c   :  { %v243_v2 = vadd.f32 %v1176_v1, %v1176_v1 }
 0x43e   :  { %v1101_v3 = vadd.f32 -1.0, %v243_v2 }
 0x440   :  { %v245_v4 = vsel %vm1275_vm4, %v1101_v3, %v1176_v1 }
 0x441   :  { %248 = vrot.lane.b32.xlu1 %v245_v4, %s1222_s20  ;;  %v246_v9 = vmul.f32 %v245_v4, %v1291_v27 }
 0x4b3   :  { %v249_v5 = vpop.permute.xlu1 %248 }
 0x4b4   :  { %v251_v6 = vmul.f32 %v249_v5, %v245_v4 }
 0x4b6   :  { %253 = vrot.lane.b32.xlu0 %v251_v6, %s1223_s21 }
 0x528   :  { %v254_v10 = vpop.permute.xlu0 %253 }
 0x529   :  { %v256_v12 = vadd.f32 %v254_v10, %v246_v9 }
 0x52b   :  { %1177 = vtanh.f32 %v256_v12 }
 0x538   :  { %v1178_v13 = vpop.eup %1177 }
 0x539   :  { %259 = vrot.lane.b32.xlu1 %v1178_v13, %s1222_s20 }
 0x5ab   :  { %v260_v14 = vpop.permute.xlu1 %259 }
 0x5ac   :  { %v262_v15 = vmul.f32 %v260_v14, %v245_v4 }
 0x5ae   :  { %264 = vrot.lane.b32.xlu0 %v262_v15, %s1223_s21 }
 0x620   :  { %v265_v16 = vpop.permute.xlu0 %264 }
 0x621   :  { %1102 = vmatmul.mubr.msk.f32.vlgmr.msra.gmra.mxu0 %vm46_vm1, %v265_v16 }
 0x622   :  { %525 = vmatpush1.msra.mxu0 %v1302_v29  ;;  %564 = vmatprep.mubr.f32.mxu0 %v1219_v0 }
 0x623   :  { %526 = vmatprep.subr.mxu0 %v1307_v30 }
 0x624   :  { %527 = vmatpush1.msra.mxu0 %v1313_v31 }
 0x625   :  { %528 = vmatprep.subr.mxu0 %v1320_v32 }
 0x626   :  { %529 = vmatpush1.msra.mxu0 %v1327_v33 }
 0x627   :  { %530 = vmatprep.subr.mxu0 %v1334_v34 }
 0x628   :  { %531 = vmatpush1.msra.mxu0 %v1341_v35 }
 0x629   :  { %756 = vmatprep.subr.mxu0 %v1297_v28 }
 0x6e1   :  { %v334_v17 = vpop.f32.mrf.mxu0 }
 0x6e2   :  { %v335_v22 = vadd.f32 %v334_v17, %v1356_v40 }
 0x6e3   :  { %v336_v18 = vpop.f32.mrf.mxu0 }
 0x6e4   :  { %v1412_v19 = vadd.f32 %v336_v18, %v1371_v47 }
 0x6e6   :  { %347 = vperm.xlu0 %1155, %v1412_v19   ;;  %341 = vperm.xlu1 %1154, %v1412_v19  }
 0x6ea   :  { %1156 = vset.pattern.permute.xlu0 %v1225_v45  ;;  %1157 = vset.pattern.permute.xlu1 %v1224_v44 }
 0x761   :  { %v348_v20 = vpop.permute.xlu0 %347  ;;  %v342_v21 = vpop.permute.xlu1 %341 }
 0x762   :  { %v344_v23 = vmul.f32 %v342_v21, %v1383_v51  ;;  %v350_v24 = vmul.f32 %v348_v20, %v1388_v52 }
 0x764   :  { %v345_v25 = vadd.f32 %v344_v23, %v335_v22 }
 0x766   :  { %v351_v26 = vadd.f32 %v350_v24, %v345_v25 }
 0x768   :  { %v352_v27 = vmul.f32 %v351_v26, %v1284_v11 }
 0x76a   :  { %v1103_v36 = vmul.f32 -1.442695, %v352_v27 }
 0x76c   :  { %1179 = vpow2.f32 %v1103_v36 }
 0x779   :  { %v1180_v37 = vpop.eup %1179 }
 0x77a   :  { %v356_v38 = vadd.f32 1.0, %v1180_v37 }
 0x77c   :  { %1181 = vrcp.f32 %v356_v38 }
 0x789   :  { %v1182_v39 = vpop.eup %1181 }
 0x78a   :  { %v359_v41 = vadd.f32 %v1182_v39, %v1182_v39 }
 0x78c   :  { %v1104_v42 = vadd.f32 -1.0, %v359_v41 }
 0x78e   :  { %v361_v43 = vsel %vm1275_vm4, %v1104_v42, %v1182_v39 }
 0x78f   :  { %364 = vrot.lane.b32.xlu1 %v361_v43, %s1222_s20  ;;  %v362_v49 = vmul.f32 %v361_v43, %v256_v12 }
 0x801   :  { %v365_v46 = vpop.permute.xlu1 %364 }
 0x802   :  { %v367_v48 = vmul.f32 %v365_v46, %v361_v43 }
 0x804   :  { %369 = vrot.lane.b32.xlu1 %v367_v48, %s1223_s21 }
 0x876   :  { %v370_v53 = vpop.permute.xlu1 %369 }
 0x877   :  { %v372_v54 = vadd.f32 %v370_v53, %v362_v49 }
 0x879   :  { %1183 = vtanh.f32 %v372_v54 }
 0x886   :  { %v1184_v55 = vpop.eup %1183 }
 0x887   :  { %375 = vrot.lane.b32.xlu0 %v1184_v55, %s1222_s20 }
 0x8f9   :  { %v376_v56 = vpop.permute.xlu0 %375 }
 0x8fa   :  { %v378_v57 = vmul.f32 %v376_v56, %v361_v43 }
 0x8fc   :  { %380 = vrot.lane.b32.xlu1 %v378_v57, %s1223_s21 }
 0x96e   :  { %v381_v58 = vpop.permute.xlu1 %380 }
 0x96f   :  { %1105 = vmatmul.mubr.msk.f32.vlgmr.msra.gmra.mxu1 %vm46_vm1, %v381_v58 }
 0x970   :  { %641 = vmatpush1.msra.mxu1 %v1302_v29  ;;  %680 = vmatprep.mubr.f32.mxu1 %v1219_v0 }
 0x971   :  { %642 = vmatprep.subr.mxu1 %v1307_v30 }
 0x972   :  { %643 = vmatpush1.msra.mxu1 %v1313_v31 }
 0x973   :  { %644 = vmatprep.subr.mxu1 %v1320_v32 }
 0x974   :  { %645 = vmatpush1.msra.mxu1 %v1327_v33 }
 0x975   :  { %646 = vmatprep.subr.mxu1 %v1334_v34 }
 0x976   :  { %647 = vmatpush1.msra.mxu1 %v1341_v35 }
 0x977   :  { %872 = vmatprep.subr.mxu1 %v1297_v28 }
 0xa2f   :  { %v450_v59 = vpop.f32.mrf.mxu1 }
 0xa30   :  { %v451_v1 = vadd.f32 %v450_v59, %v1356_v40 }
 0xa31   :  { %v452_v60 = vpop.f32.mrf.mxu1 }
 0xa32   :  { %v1439_v61 = vadd.f32 %v452_v60, %v1371_v47 }
 0xa34   :  { %463 = vperm.xlu1 %1157, %v1439_v61   ;;  %457 = vperm.xlu0 %1156, %v1439_v61  }
 0xa38   :  { %1158 = vset.pattern.permute.xlu1 %v1225_v45  ;;  %1159 = vset.pattern.permute.xlu0 %v1224_v44 }
 0xaaf   :  { %v464_v62 = vpop.permute.xlu1 %463  ;;  %v458_v63 = vpop.permute.xlu0 %457 }
 0xab0   :  { %v460_v2 = vmul.f32 %v458_v63, %v1383_v51  ;;  %v466_v3 = vmul.f32 %v464_v62, %v1388_v52 }
 0xab2   :  { %v461_v4 = vadd.f32 %v460_v2, %v451_v1 }
 0xab4   :  { %v467_v5 = vadd.f32 %v466_v3, %v461_v4 }
 0xab6   :  { %v468_v6 = vmul.f32 %v467_v5, %v1284_v11 }
 0xab8   :  { %v1106_v9 = vmul.f32 -1.442695, %v468_v6 }
 0xaba   :  { %1185 = vpow2.f32 %v1106_v9 }
 0xac7   :  { %v1186_v10 = vpop.eup %1185 }
 0xac8   :  { %v472_v12 = vadd.f32 1.0, %v1186_v10 }
 0xaca   :  { %1187 = vrcp.f32 %v472_v12 }
 0xad7   :  { %v1188_v13 = vpop.eup %1187 }
 0xad8   :  { %v475_v14 = vadd.f32 %v1188_v13, %v1188_v13 }
 0xada   :  { %v1107_v15 = vadd.f32 -1.0, %v475_v14 }
 0xadc   :  { %v477_v16 = vsel %vm1275_vm4, %v1107_v15, %v1188_v13 }
 0xadd   :  { %480 = vrot.lane.b32.xlu1 %v477_v16, %s1222_s20  ;;  %v478_v20 = vmul.f32 %v477_v16, %v372_v54 }
 0xb4f   :  { %v481_v17 = vpop.permute.xlu1 %480 }
 0xb50   :  { %v483_v18 = vmul.f32 %v481_v17, %v477_v16 }
 0xb52   :  { %485 = vrot.lane.b32.xlu0 %v483_v18, %s1223_s21 }
 0xbc4   :  { %v486_v21 = vpop.permute.xlu0 %485 }
 0xbc5   :  { %v488_v22 = vadd.f32 %v486_v21, %v478_v20 }
 0xbc7   :  { %1189 = vtanh.f32 %v488_v22 }
 0xbd4   :  { %v1190_v23 = vpop.eup %1189 }
 0xbd5   :  { %491 = vrot.lane.b32.xlu1 %v1190_v23, %s1222_s20 }
 0xc47   :  { %v492_v24 = vpop.permute.xlu1 %491 }
 0xc48   :  { %v494_v25 = vmul.f32 %v492_v24, %v477_v16 }
 0xc4a   :  { %496 = vrot.lane.b32.xlu0 %v494_v25, %s1223_s21 }
 0xcbc   :  { %v497_v26 = vpop.permute.xlu0 %496 }
 0xcbd   :  { %1108 = vmatmul.mubr.msk.f32.vlgmr.msra.gmra.mxu0 %vm46_vm1, %v497_v26 }
 0xcbe   :  { %757 = vmatpush1.msra.mxu0 %v1302_v29  ;;  %796 = vmatprep.mubr.f32.mxu0 %v1219_v0 }
 0xcbf   :  { %758 = vmatprep.subr.mxu0 %v1307_v30 }
 0xcc0   :  { %759 = vmatpush1.msra.mxu0 %v1313_v31 }
 0xcc1   :  { %760 = vmatprep.subr.mxu0 %v1320_v32 }
 0xcc2   :  { %761 = vmatpush1.msra.mxu0 %v1327_v33 }
 0xcc3   :  { %762 = vmatprep.subr.mxu0 %v1334_v34 }
 0xcc4   :  { %763 = vmatpush1.msra.mxu0 %v1341_v35 }
 0xcc5   :  { %988 = vmatprep.subr.mxu0 %v1297_v28 }
 0xd7d   :  { %v566_v27 = vpop.f32.mrf.mxu0 }
 0xd7e   :  { %v567_v41 = vadd.f32 %v566_v27, %v1356_v40 }
 0xd7f   :  { %v568_v36 = vpop.f32.mrf.mxu0 }
 0xd80   :  { %v1466_v37 = vadd.f32 %v568_v36, %v1371_v47 }
 0xd82   :  { %579 = vperm.xlu0 %1159, %v1466_v37   ;;  %573 = vperm.xlu1 %1158, %v1466_v37  }
 0xd86   :  { %1160 = vset.pattern.permute.xlu0 %v1225_v45  ;;  %1161 = vset.pattern.permute.xlu1 %v1224_v44 }
 0xdfd   :  { %v580_v38 = vpop.permute.xlu0 %579  ;;  %v574_v39 = vpop.permute.xlu1 %573 }
 0xdfe   :  { %v576_v42 = vmul.f32 %v574_v39, %v1383_v51  ;;  %v582_v28 = vmul.f32 %v580_v38, %v1388_v52 }
 0xe00   :  { %v577_v43 = vadd.f32 %v576_v42, %v567_v41 }
 0xe02   :  { %v583_v46 = vadd.f32 %v582_v28, %v577_v43 }
 0xe04   :  { %v584_v48 = vmul.f32 %v583_v46, %v1284_v11 }
 0xe06   :  { %v1109_v49 = vmul.f32 -1.442695, %v584_v48 }
 0xe08   :  { %1191 = vpow2.f32 %v1109_v49 }
 0xe15   :  { %v1192_v53 = vpop.eup %1191 }
 0xe16   :  { %v588_v54 = vadd.f32 1.0, %v1192_v53 }
 0xe18   :  { %1193 = vrcp.f32 %v588_v54 }
 0xe25   :  { %v1194_v55 = vpop.eup %1193 }
 0xe26   :  { %v591_v56 = vadd.f32 %v1194_v55, %v1194_v55 }
 0xe28   :  { %v1110_v57 = vadd.f32 -1.0, %v591_v56 }
 0xe2a   :  { %v593_v58 = vsel %vm1275_vm4, %v1110_v57, %v1194_v55 }
 0xe2b   :  { %596 = vrot.lane.b32.xlu1 %v593_v58, %s1222_s20  ;;  %v594_v62 = vmul.f32 %v593_v58, %v488_v22 }
 0xe9d   :  { %v597_v59 = vpop.permute.xlu1 %596 }
 0xe9e   :  { %v599_v60 = vmul.f32 %v597_v59, %v593_v58 }
 0xea0   :  { %601 = vrot.lane.b32.xlu1 %v599_v60, %s1223_s21 }
 0xf12   :  { %v602_v63 = vpop.permute.xlu1 %601 }
 0xf13   :  { %v604_v1 = vadd.f32 %v602_v63, %v594_v62 }
 0xf15   :  { %1195 = vtanh.f32 %v604_v1 }
 0xf22   :  { %v1196_v2 = vpop.eup %1195 }
 0xf23   :  { %607 = vrot.lane.b32.xlu0 %v1196_v2, %s1222_s20 }
 0xf95   :  { %v608_v3 = vpop.permute.xlu0 %607 }
 0xf96   :  { %v610_v4 = vmul.f32 %v608_v3, %v593_v58 }
 0xf98   :  { %612 = vrot.lane.b32.xlu1 %v610_v4, %s1223_s21 }
0x100a   :  { %v613_v5 = vpop.permute.xlu1 %612 }
0x100b   :  { %1111 = vmatmul.mubr.msk.f32.vlgmr.msra.gmra.mxu1 %vm46_vm1, %v613_v5 }
0x100c   :  { %873 = vmatpush1.msra.mxu1 %v1302_v29  ;;  %912 = vmatprep.mubr.f32.mxu1 %v1219_v0 }
0x100d   :  { %874 = vmatprep.subr.mxu1 %v1307_v30 }
0x100e   :  { %875 = vmatpush1.msra.mxu1 %v1313_v31 }
0x100f   :  { %876 = vmatprep.subr.mxu1 %v1320_v32 }
0x1010   :  { %877 = vmatpush1.msra.mxu1 %v1327_v33 }
0x1011   :  { %878 = vmatprep.subr.mxu1 %v1334_v34 }
0x1012   :  { %879 = vmatpush1.msra.mxu1 %v1341_v35 }
0x10cb   :  { %v682_v6 = vpop.f32.mrf.mxu1 }
0x10cc   :  { %v683_v14 = vadd.f32 %v682_v6, %v1356_v40 }
0x10cd   :  { %v684_v9 = vpop.f32.mrf.mxu1 }
0x10ce   :  { %v1492_v10 = vadd.f32 %v684_v9, %v1371_v47 }
0x10d0   :  { %695 = vperm.xlu1 %1161, %v1492_v10   ;;  %689 = vperm.xlu0 %1160, %v1492_v10  }
0x10d4   :  { %1162 = vset.pattern.permute.xlu1 %v1225_v45  ;;  %1163 = vset.pattern.permute.xlu0 %v1224_v44 }
0x114b   :  { %v696_v12 = vpop.permute.xlu1 %695  ;;  %v690_v13 = vpop.permute.xlu0 %689 }
0x114c   :  { %v692_v15 = vmul.f32 %v690_v13, %v1383_v51  ;;  %v698_v16 = vmul.f32 %v696_v12, %v1388_v52 }
0x114e   :  { %v693_v17 = vadd.f32 %v692_v15, %v683_v14 }
0x1150   :  { %v699_v18 = vadd.f32 %v698_v16, %v693_v17 }
0x1152   :  { %v700_v20 = vmul.f32 %v699_v18, %v1284_v11 }
0x1154   :  { %v1112_v21 = vmul.f32 -1.442695, %v700_v20 }
0x1156   :  { %1197 = vpow2.f32 %v1112_v21 }
0x1163   :  { %v1198_v22 = vpop.eup %1197 }
0x1164   :  { %v704_v23 = vadd.f32 1.0, %v1198_v22 }
0x1166   :  { %1199 = vrcp.f32 %v704_v23 }
0x1173   :  { %v1200_v24 = vpop.eup %1199 }
0x1174   :  { %v707_v25 = vadd.f32 %v1200_v24, %v1200_v24 }
0x1176   :  { %v1113_v26 = vadd.f32 -1.0, %v707_v25 }
0x1178   :  { %v709_v27 = vsel %vm1275_vm4, %v1113_v26, %v1200_v24 }
0x1179   :  { %712 = vrot.lane.b32.xlu1 %v709_v27, %s1222_s20  ;;  %v710_v39 = vmul.f32 %v709_v27, %v604_v1 }
0x11eb   :  { %v713_v36 = vpop.permute.xlu1 %712 }
0x11ec   :  { %v715_v38 = vmul.f32 %v713_v36, %v709_v27 }
0x11ee   :  { %717 = vrot.lane.b32.xlu0 %v715_v38, %s1223_s21 }
0x1260   :  { %v718_v41 = vpop.permute.xlu0 %717 }
0x1261   :  { %v720_v42 = vadd.f32 %v718_v41, %v710_v39 }
0x1263   :  { %1201 = vtanh.f32 %v720_v42 }
0x1270   :  { %v1202_v28 = vpop.eup %1201 }
0x1271   :  { %723 = vrot.lane.b32.xlu1 %v1202_v28, %s1222_s20 }
0x12e3   :  { %v724_v43 = vpop.permute.xlu1 %723 }
0x12e4   :  { %v726_v46 = vmul.f32 %v724_v43, %v709_v27 }
0x12e6   :  { %728 = vrot.lane.b32.xlu0 %v726_v46, %s1223_s21 }
0x1358   :  { %v729_v48 = vpop.permute.xlu0 %728 }
0x1359   :  { %1114 = vmatmul.mubr.msk.f32.vlgmr.msra.gmra.mxu0 %vm46_vm1, %v729_v48 }
0x135a   :  { %989 = vmatpush1.msra.mxu0 %v1302_v29  ;;  %1028 = vmatprep.mubr.f32.mxu0 %v1219_v0 }
0x135b   :  { %990 = vmatprep.subr.mxu0 %v1307_v30 }
0x135c   :  { %991 = vmatpush1.msra.mxu0 %v1313_v31 }
0x135d   :  { %992 = vmatprep.subr.mxu0 %v1320_v32 }
0x135e   :  { %993 = vmatpush1.msra.mxu0 %v1327_v33 }
0x135f   :  { %994 = vmatprep.subr.mxu0 %v1334_v34 }
0x1360   :  { %995 = vmatpush1.msra.mxu0 %v1341_v35 }
0x1419   :  { %v798_v49 = vpop.f32.mrf.mxu0 }
0x141a   :  { %v799_v30 = vadd.f32 %v798_v49, %v1356_v40 }
0x141b   :  { %v800_v53 = vpop.f32.mrf.mxu0 }
0x141c   :  { %v1518_v54 = vadd.f32 %v800_v53, %v1371_v47 }
0x141e   :  { %811 = vperm.xlu0 %1163, %v1518_v54   ;;  %805 = vperm.xlu1 %1162, %v1518_v54  }
0x1422   :  { %1164 = vset.pattern.permute.xlu0 %v1225_v45  ;;  %1165 = vset.pattern.permute.xlu1 %v1224_v44 }
0x1499   :  { %v812_v0 = vpop.permute.xlu0 %811  ;;  %v806_v29 = vpop.permute.xlu1 %805 }
0x149a   :  { %v808_v31 = vmul.f32 %v806_v29, %v1383_v51  ;;  %v814_v32 = vmul.f32 %v812_v0, %v1388_v52 }
0x149c   :  { %v809_v33 = vadd.f32 %v808_v31, %v799_v30 }
0x149e   :  { %v815_v34 = vadd.f32 %v814_v32, %v809_v33 }
0x14a0   :  { %v816_v35 = vmul.f32 %v815_v34, %v1284_v11 }
0x14a2   :  { %v1115_v55 = vmul.f32 -1.442695, %v816_v35 }
0x14a4   :  { %1203 = vpow2.f32 %v1115_v55 }
0x14b1   :  { %v1204_v56 = vpop.eup %1203 }
0x14b2   :  { %v820_v57 = vadd.f32 1.0, %v1204_v56 }
0x14b4   :  { %1205 = vrcp.f32 %v820_v57 }
0x14c1   :  { %v1206_v45 = vpop.eup %1205 }
0x14c2   :  { %v823_v58 = vadd.f32 %v1206_v45, %v1206_v45 }
0x14c4   :  { %v1116_v59 = vadd.f32 -1.0, %v823_v58 }
0x14c6   :  { %v825_v60 = vsel %vm1275_vm4, %v1116_v59, %v1206_v45 }
0x14c7   :  { %828 = vrot.lane.b32.xlu1 %v825_v60, %s1222_s20  ;;  %v826_v1 = vmul.f32 %v825_v60, %v720_v42 }
0x1539   :  { %v829_v62 = vpop.permute.xlu1 %828 }
0x153a   :  { %v831_v63 = vmul.f32 %v829_v62, %v825_v60 }
0x153c   :  { %833 = vrot.lane.b32.xlu1 %v831_v63, %s1223_s21 }
0x15ae   :  { %v834_v2 = vpop.permute.xlu1 %833 }
0x15af   :  { %v836_v3 = vadd.f32 %v834_v2, %v826_v1 }
0x15b1   :  { %1207 = vtanh.f32 %v836_v3 }
0x15be   :  { %v1208_v4 = vpop.eup %1207 }
0x15bf   :  { %839 = vrot.lane.b32.xlu0 %v1208_v4, %s1222_s20 }
0x1631   :  { %v840_v5 = vpop.permute.xlu0 %839 }
0x1632   :  { %v842_v6 = vmul.f32 %v840_v5, %v825_v60 }
0x1634   :  { %844 = vrot.lane.b32.xlu1 %v842_v6, %s1223_s21 }
0x16a6   :  { %v845_v9 = vpop.permute.xlu1 %844 }
0x16a7   :  { %1117 = vmatmul.mubr.msk.f32.vlgmr.msra.gmra.mxu1 %vm46_vm1, %v845_v9 }
0x1767   :  { %v914_v12 = vpop.f32.mrf.mxu1 }
0x1768   :  { %v915_v17 = vadd.f32 %v914_v12, %v1356_v40 }
0x1769   :  { %v916_v13 = vpop.f32.mrf.mxu1 }
0x176a   :  { %v917_v14 = vadd.f32 %v916_v13, %v1371_v47 }
0x176c   :  { %927 = vperm.xlu1 %1165, %v917_v14   ;;  %921 = vperm.xlu0 %1164, %v917_v14  }
0x1770   :  { %1166 = vset.pattern.permute.xlu0 %v1224_v44 }
0x17e7   :  { %v928_v15 = vpop.permute.xlu1 %927  ;;  %v922_v16 = vpop.permute.xlu0 %921 }
0x17e8   :  { %v924_v18 = vmul.f32 %v922_v16, %v1383_v51  ;;  %v930_v20 = vmul.f32 %v928_v15, %v1388_v52 }
0x17ea   :  { %v925_v21 = vadd.f32 %v924_v18, %v915_v17 }
0x17ec   :  { %v931_v22 = vadd.f32 %v930_v20, %v925_v21 }
0x17ee   :  { %v932_v23 = vmul.f32 %v931_v22, %v1284_v11 }
0x17f0   :  { %v1118_v24 = vmul.f32 -1.442695, %v932_v23 }
0x17f2   :  { %1209 = vpow2.f32 %v1118_v24 }
0x17ff   :  { %v1210_v25 = vpop.eup %1209 }
0x1800   :  { %v936_v26 = vadd.f32 1.0, %v1210_v25 }
0x1802   :  { %1211 = vrcp.f32 %v936_v26 }
0x180f   :  { %v1212_v27 = vpop.eup %1211 }
0x1810   :  { %v939_v36 = vadd.f32 %v1212_v27, %v1212_v27 }
0x1812   :  { %v1119_v44 = vadd.f32 -1.0, %v939_v36 }
0x1814   :  { %v941_v38 = vsel %vm1275_vm4, %v1119_v44, %v1212_v27 }
0x1815   :  { %944 = vrot.lane.b32.xlu1 %v941_v38, %s1222_s20  ;;  %v942_v52 = vmul.f32 %v941_v38, %v836_v3 }
0x1887   :  { %v945_v40 = vpop.permute.xlu1 %944 }
0x1888   :  { %v947_v51 = vmul.f32 %v945_v40, %v941_v38 }
0x188a   :  { %949 = vrot.lane.b32.xlu0 %v947_v51, %s1223_s21 }
0x18fc   :  { %v950_v39 = vpop.permute.xlu0 %949 }
0x18fd   :  { %v952_v11 = vadd.f32 %v950_v39, %v942_v52 }
0x18ff   :  { %1213 = vtanh.f32 %v952_v11 }
0x190c   :  { %v1214_v41 = vpop.eup %1213 }
0x190d   :  { %955 = vrot.lane.b32.xlu1 %v1214_v41, %s1222_s20  ;;  %s1232_s20 = smov 28  }
0x1911   :  { %1034 = vrot.lane.b32.xlu1 %v1412_v19, %s1226_s1 }
0x1915   :  { %1040 = vrot.lane.b32.xlu1 %v1466_v37, %s1227_s16 }
0x1919   :  { %1046 = vrot.lane.b32.xlu1 %v1518_v54, %s1228_s17 }
0x197f   :  { %v956_v8 = vpop.permute.xlu1 %955 }
0x1980   :  { %v958_v42 = vmul.f32 %v956_v8, %v941_v38 }
0x1982   :  { %960 = vrot.lane.b32.xlu0 %v958_v42, %s1223_s21 }
0x1983   :  { %v1035_v46 = vpop.permute.xlu1 %1034 }
0x1986   :  { %1037 = vrot.lane.b32.xlu0 %v1439_v61, %s1229_s18  ;;  %v1057_v61 = vsel %vm1056_vm5, %v1374_v50, %v1035_v46  ;;  %v1074_v50 = vand.u32 3, %v1271_v7 }
0x1987   :  { %v1041_v49 = vpop.permute.xlu1 %1040 }
0x1988   :  { %vm1082_vm12 = vcmp.eq.s32.totalorder %v1074_v50, 2 }
0x198a   :  { %1043 = vrot.lane.b32.xlu0 %v1492_v10, %s1230_s0 }
0x198b   :  { %v1047_v0 = vpop.permute.xlu1 %1046 }
0x198e   :  { %1049 = vrot.lane.b32.xlu0 %v917_v14, %s1231_s19 }
0x19f4   :  { %v961_v28 = vpop.permute.xlu0 %960 }
0x19f5   :  { %1120 = vmatmul.mubr.msk.f32.vlgmr.msra.gmra.mxu0 %vm46_vm1, %v961_v28 }
0x19f8   :  { %v1038_v48 = vpop.permute.xlu0 %1037 }
0x19f9   :  { %v1059_v10 = vsel %vm1058_vm6, %v1057_v61, %v1038_v48 }
0x19fa   :  { %v1061_v54 = vsel %vm1060_vm7, %v1059_v10, %v1041_v49 }
0x19fc   :  { %v1044_v53 = vpop.permute.xlu0 %1043 }
0x19fd   :  { %v1063_v29 = vsel %vm1062_vm8, %v1061_v54, %v1044_v53 }
0x1a00   :  { %v1050_v30 = vpop.permute.xlu0 %1049 }
0x1ab5   :  { %v1030_v19 = vpop.f32.mrf.mxu0 }
0x1ab7   :  { %v1031_v37 = vpop.f32.mrf.mxu0 }
0x1ab8   :  { %v1032_v43 = vadd.f32 %v1031_v37, %v1371_v47  ;;  %v1065_v47 = vsel %vm1064_vm9, %v1063_v29, %v1047_v0 }
0x1ab9   :  { %v1067_v31 = vsel %vm1066_vm10, %v1065_v47, %v1050_v30 }
0x1aba   :  { %1053 = vrot.lane.b32.xlu1 %v1032_v43, %s1232_s20 }
0x1b2c   :  { %v1054_v32 = vpop.permute.xlu1 %1053 }
0x1b2d   :  { %v1069_v33 = vsel %vm1068_vm11, %v1067_v31, %v1054_v32 }
0x1b2e   :  { %v1121_v34 = vmul.f32 -1.442695, %v1069_v33 }
0x1b30   :  { %1215 = vpow2.f32 %v1121_v34 }
0x1b3d   :  { %v1216_v35 = vpop.eup %1215 }
0x1b3e   :  { %v1086_v55 = vadd.f32 1.0, %v1216_v35 }
0x1b40   :  { %1217 = vrcp.f32 %v1086_v55 }
0x1b4d   :  { %v1218_v56 = vpop.eup %1217 }
0x1b4e   :  { %v1089_v57 = vsel %vm1082_vm12, %v1218_v56, %v1069_v33 }
0x1b4f   :  { %1090 = vst.msk [vmem:[%s1562_s2] sm:$0xff] %vm46_vm1, %v1089_v57 }

</bundles_post_ra>
